<compile_context>
chip_gen: v5e
topology: v5e:2x2
jax: 0.10.0
libtpu: 0.0.40
codegen_flags: <defaults>
</compile_context>

<pallas_src>
import functools

import jax
import jax.numpy as jnp
from jax.experimental import pallas as pl
from jax.experimental.pallas import tpu as pltpu


# --------------------------------------------------------------------------
# Pallas kernel: single-shot fused matmul + bias + activation.
# --------------------------------------------------------------------------
def _fused_matmul_kernel(a_ref, w_ref, b_ref, o_ref, *, activation):
    y = jnp.dot(a_ref[...], w_ref[...], preferred_element_type=jnp.float32)
    y = y + b_ref[...]
    if activation == "relu":
        y = jnp.maximum(y, 0.0)
    o_ref[...] = y.astype(o_ref.dtype)


def pallas_linear(a, w, b, activation="none", out_dtype=jnp.float32):
    """act(a:(M,K) @ w:(K,N) + b:(N,)) in one fused Pallas call.

    K and N are kept whole (everything fits VMEM); M is optionally split into
    two parallel blocks so v7x's second TensorCore gets work.
    """
    M, K = a.shape
    K2, N = w.shape
    assert K == K2

    a = a.astype(jnp.bfloat16)          # feed the MXU at native bf16 rate
    w = w.astype(jnp.bfloat16)
    b = b.astype(jnp.float32).reshape(1, N)

    # Parallel M tiling (2 blocks) when it keeps sublane alignment.
    tm = M // 2 if (M % 16 == 0 and M >= 16) else M
    grid = (M // tm,)

    # Double-buffered inputs/outputs + headroom; keep well under v7x's 64 MiB.
    vmem_bytes = 2 * (tm * K + K * N) * 2 + 2 * tm * N * 4 + 2 * N * 4
    vmem_bytes = int(min(max(vmem_bytes + (4 << 20), 8 << 20), 48 << 20))

    return pl.pallas_call(
        functools.partial(_fused_matmul_kernel, activation=activation),
        out_shape=jax.ShapeDtypeStruct((M, N), out_dtype),
        grid_spec=pltpu.PrefetchScalarGridSpec(
            num_scalar_prefetch=0,
            grid=grid,
            in_specs=[
                pl.BlockSpec((tm, K), lambda i: (i, 0)),
                pl.BlockSpec((K, N), lambda i: (0, 0)),
                pl.BlockSpec((1, N), lambda i: (0, 0)),
            ],
            out_specs=pl.BlockSpec((tm, N), lambda i: (i, 0)),
        ),
        compiler_params=pltpu.CompilerParams(
            dimension_semantics=("parallel",),
            vmem_limit_bytes=vmem_bytes,
        ),
    )(a, w, b)


# --------------------------------------------------------------------------
# Glue: NHWC im2col and eval-mode BatchNorm folding.
# --------------------------------------------------------------------------
def im2col_nhwc(x, kh, kw, stride, pad):
    """x: (N, H, W, C) -> (N*OH*OW, KH*KW*C); feature order (ky, kx, c)."""
    n, h, w, c = x.shape
    xp = jnp.pad(x, ((0, 0), (pad, pad), (pad, pad), (0, 0)))
    oh = (h + 2 * pad - kh) // stride + 1
    ow = (w + 2 * pad - kw) // stride + 1
    cols = [xp[:, ky:ky + stride * oh:stride, kx:kx + stride * ow:stride, :]
            for ky in range(kh) for kx in range(kw)]
    patches = jnp.concatenate(cols, axis=-1)         # (n, oh, ow, kh*kw*c)
    return patches.reshape(n * oh * ow, kh * kw * c), oh, ow


def torch_conv_weight_to_mat(w):
    """(out_C, in_C, KH, KW) -> (KH*KW*in_C, out_C), row order (ky, kx, c)."""
    out_c = w.shape[0]
    return w.transpose(2, 3, 1, 0).reshape(-1, out_c)


def fold_bn(w_mat, bias, gamma, beta, rmean, rvar, eps=1e-5):
    """Fold eval-mode BatchNorm into a (K, out_C) matmul weight and bias."""
    scale = gamma / jnp.sqrt(rvar + eps)
    return w_mat * scale[None, :], bias * scale + (beta - rmean * scale)


def conv_bn_relu_nhwc(x_nhwc, w_mat, b, kh, kw, stride, pad,
                      out_dtype=jnp.float32):
    """Conv+BN+ReLU as im2col + fused Pallas matmul.  Returns NHWC."""
    n = x_nhwc.shape[0]
    out_c = w_mat.shape[1]
    patches, oh, ow = im2col_nhwc(x_nhwc, kh, kw, stride, pad)
    y = pallas_linear(patches, w_mat, b, "relu", out_dtype)   # (n*oh*ow, out_c)
    return y.reshape(n, oh, ow, out_c)


# --------------------------------------------------------------------------
# Encoder forward (matches the PyTorch Encoder module, eval-mode BN).
# --------------------------------------------------------------------------
class Args:
    def __init__(self, channels):
        self.channels = channels


def encoder_forward(x_nchw, p, args):
    n, c, h, w = x_nchw.shape
    assert c == args.channels

    x = x_nchw.transpose(0, 2, 3, 1)                          # NHWC once

    w1 = torch_conv_weight_to_mat(p["conv1_w"])
    w1, b1 = fold_bn(w1, p["conv1_b"], p["bn1_g"], p["bn1_b"],
                     p["bn1_m"], p["bn1_v"])
    h1 = conv_bn_relu_nhwc(x, w1, b1, 4, 4, 2, 1,
                           out_dtype=jnp.bfloat16)            # (n, h/2, w/2, 64)

    w2 = torch_conv_weight_to_mat(p["conv2_w"])
    w2, b2 = fold_bn(w2, p["conv2_b"], p["bn2_g"], p["bn2_b"],
                     p["bn2_m"], p["bn2_v"])
    h2 = conv_bn_relu_nhwc(h1, w2, b2, 4, 4, 2, 1,
                           out_dtype=jnp.float32)             # (n, h/4, w/4, 128)

    return h2.transpose(0, 3, 1, 2)                           # back to NCHW


# --------------------------------------------------------------------------
# Deterministic parameter init (synthetic, not a checkpoint).
# --------------------------------------------------------------------------
def init_params(key, args):
    ch = args.channels
    shapes = {
        "conv1_w": (64, ch, 4, 4), "conv1_b": (64,),
        "bn1_g": (64,), "bn1_b": (64,), "bn1_m": (64,), "bn1_v": (64,),
        "conv2_w": (128, 64, 4, 4), "conv2_b": (128,),
        "bn2_g": (128,), "bn2_b": (128,), "bn2_m": (128,), "bn2_v": (128,),
    }
    params = {}
    keys = jax.random.split(key, len(shapes))
    for (name, shape), k in zip(shapes.items(), keys):
        if name.endswith("_v"):      # BN running_var: strictly positive
            params[name] = 1.0 + 0.1 * jax.random.uniform(k, shape, dtype=jnp.float32)
        elif name.endswith("_g"):    # BN gamma near 1
            params[name] = 1.0 + 0.05 * jax.random.normal(k, shape, dtype=jnp.float32)
        else:
            params[name] = 0.05 * jax.random.normal(k, shape, dtype=jnp.float32)
    return params


# --------------------------------------------------------------------------
if __name__ == "__main__":
    args = Args(channels=4)
    key = jax.random.PRNGKey(0)
    kp, kx = jax.random.split(key)
    params = init_params(kp, args)
    x = jax.random.normal(kx, (2, args.channels, 16, 16), dtype=jnp.float32)

    fwd = jax.jit(lambda xx, pp: encoder_forward(xx, pp, args))
    out = fwd(x, params)
    jax.block_until_ready(out)

    assert out.shape == (2, 128, 4, 4) and out.dtype == jnp.float32
    assert bool(jnp.all(jnp.isfinite(out)))
    assert bool(jnp.all(out >= 0.0))   # ReLU range

    print("KERNEL_OK")
</pallas_src>

<mosaic_0001>
module attributes {stable_mosaic.version = 11 : i64} {
  func.func @_fused_matmul_kernel(%arg0: i32, %arg1: memref<64x64xbf16, #tpu.memory_space<vmem>>, %arg2: memref<64x64xbf16, #tpu.memory_space<vmem>>, %arg3: memref<1x64xf32, #tpu.memory_space<vmem>>, %arg4: memref<64x64xbf16, #tpu.memory_space<vmem>>) attributes {dimension_semantics = [#tpu.dimension_semantics<parallel>], iteration_bounds = array<i64: 2>, scalar_prefetch = 0 : i64, scratch_operands = 0 : i64, tpu.core_type = #tpu.core_type<tc>, window_params = [{transform_indices = @transform_0, window_bounds = array<i64: 64, 64>}, {pipeline_mode = #tpu.pipeline_mode<synchronous>, transform_indices = @transform_1, window_bounds = array<i64: 64, 64>}, {pipeline_mode = #tpu.pipeline_mode<synchronous>, transform_indices = @transform_2, window_bounds = array<i64: 1, 64>}, {transform_indices = @transform_3, window_bounds = array<i64: 64, 64>}]} {
    %c0 = arith.constant 0 : index
    %c0_0 = arith.constant 0 : index
    %0 = vector.load %arg1[%c0, %c0_0] : memref<64x64xbf16, #tpu.memory_space<vmem>>, vector<64x64xbf16>
    %c0_1 = arith.constant 0 : index
    %c0_2 = arith.constant 0 : index
    %1 = vector.load %arg2[%c0_1, %c0_2] : memref<64x64xbf16, #tpu.memory_space<vmem>>, vector<64x64xbf16>
    %cst = arith.constant dense<0.000000e+00> : vector<64x64xf32>
    %2 = tpu.matmul %0, %1, %cst {dimension_numbers = #tpu.dot_dimension_numbers<[1], [0], [0], [1], [0, 0, 1, 1], [], []>} : vector<64x64xbf16>, vector<64x64xbf16>, vector<64x64xf32> -> vector<64x64xf32>
    %c0_3 = arith.constant 0 : index
    %c0_4 = arith.constant 0 : index
    %3 = vector.load %arg3[%c0_3, %c0_4] : memref<1x64xf32, #tpu.memory_space<vmem>>, vector<1x64xf32>
    %4 = vector.broadcast %3 : vector<1x64xf32> to vector<64x64xf32>
    %5 = arith.addf %2, %4 : vector<64x64xf32>
    %cst_5 = arith.constant 0.000000e+00 : f32
    %6 = vector.broadcast %cst_5 : f32 to vector<64x64xf32>
    %7 = arith.maximumf %5, %6 : vector<64x64xf32>
    %8 = arith.truncf %7 : vector<64x64xf32> to vector<64x64xbf16>
    %c0_6 = arith.constant 0 : index
    %c0_7 = arith.constant 0 : index
    %9 = vector.load %arg4[%c0_6, %c0_7] : memref<64x64xbf16, #tpu.memory_space<vmem>>, vector<64x64xbf16>
    tpu.vector_store %arg4[%c0_6, %c0_7], %8 {strides = array<i32>} : memref<64x64xbf16, #tpu.memory_space<vmem>>, vector<64x64xbf16>,
    return
  }
  func.func @transform_0(%arg0: i32) -> (i32, i32) {
    %c0_i32 = arith.constant 0 : i32
    %c0_i32_0 = arith.constant 0 : i32
    return %arg0, %c0_i32 : i32, i32
  }
  func.func @transform_1(%arg0: i32) -> (i32, i32) {
    %c0_i32 = arith.constant 0 : i32
    %c0_i32_0 = arith.constant 0 : i32
    %c0_i32_1 = arith.constant 0 : i32
    return %c0_i32, %c0_i32_0 : i32, i32
  }
  func.func @transform_2(%arg0: i32) -> (i32, i32) {
    %c0_i32 = arith.constant 0 : i32
    %c0_i32_0 = arith.constant 0 : i32
    %c0_i32_1 = arith.constant 0 : i32
    return %c0_i32, %c0_i32_0 : i32, i32
  }
  func.func @transform_3(%arg0: i32) -> (i32, i32) {
    %c0_i32 = arith.constant 0 : i32
    %c0_i32_0 = arith.constant 0 : i32
    return %arg0, %c0_i32 : i32, i32
  }
}

module attributes {stable_mosaic.version = 11 : i64} {
  func.func @_fused_matmul_kernel(%arg0: i32, %arg1: memref<16x1024xbf16, #tpu.memory_space<vmem>>, %arg2: memref<1024x128xbf16, #tpu.memory_space<vmem>>, %arg3: memref<1x128xf32, #tpu.memory_space<vmem>>, %arg4: memref<16x128xf32, #tpu.memory_space<vmem>>) attributes {dimension_semantics = [#tpu.dimension_semantics<parallel>], iteration_bounds = array<i64: 2>, scalar_prefetch = 0 : i64, scratch_operands = 0 : i64, tpu.core_type = #tpu.core_type<tc>, window_params = [{transform_indices = @transform_0, window_bounds = array<i64: 16, 1024>}, {pipeline_mode = #tpu.pipeline_mode<synchronous>, transform_indices = @transform_1, window_bounds = array<i64: 1024, 128>}, {pipeline_mode = #tpu.pipeline_mode<synchronous>, transform_indices = @transform_2, window_bounds = array<i64: 1, 128>}, {transform_indices = @transform_3, window_bounds = array<i64: 16, 128>}]} {
    %c0 = arith.constant 0 : index
    %c0_0 = arith.constant 0 : index
    %0 = vector.load %arg1[%c0, %c0_0] : memref<16x1024xbf16, #tpu.memory_space<vmem>>, vector<16x1024xbf16>
    %c0_1 = arith.constant 0 : index
    %c0_2 = arith.constant 0 : index
    %1 = vector.load %arg2[%c0_1, %c0_2] : memref<1024x128xbf16, #tpu.memory_space<vmem>>, vector<1024x128xbf16>
    %cst = arith.constant dense<0.000000e+00> : vector<16x128xf32>
    %2 = tpu.matmul %0, %1, %cst {dimension_numbers = #tpu.dot_dimension_numbers<[1], [0], [0], [1], [0, 0, 1, 1], [], []>} : vector<16x1024xbf16>, vector<1024x128xbf16>, vector<16x128xf32> -> vector<16x128xf32>
    %c0_3 = arith.constant 0 : index
    %c0_4 = arith.constant 0 : index
    %3 = vector.load %arg3[%c0_3, %c0_4] : memref<1x128xf32, #tpu.memory_space<vmem>>, vector<1x128xf32>
    %4 = vector.broadcast %3 : vector<1x128xf32> to vector<16x128xf32>
    %5 = arith.addf %2, %4 : vector<16x128xf32>
    %cst_5 = arith.constant 0.000000e+00 : f32
    %6 = vector.broadcast %cst_5 : f32 to vector<16x128xf32>
    %7 = arith.maximumf %5, %6 : vector<16x128xf32>
    %c0_6 = arith.constant 0 : index
    %c0_7 = arith.constant 0 : index
    %8 = vector.load %arg4[%c0_6, %c0_7] : memref<16x128xf32, #tpu.memory_space<vmem>>, vector<16x128xf32>
    tpu.vector_store %arg4[%c0_6, %c0_7], %7 {strides = array<i32>} : memref<16x128xf32, #tpu.memory_space<vmem>>, vector<16x128xf32>,
    return
  }
  func.func @transform_0(%arg0: i32) -> (i32, i32) {
    %c0_i32 = arith.constant 0 : i32
    %c0_i32_0 = arith.constant 0 : i32
    return %arg0, %c0_i32 : i32, i32
  }
  func.func @transform_1(%arg0: i32) -> (i32, i32) {
    %c0_i32 = arith.constant 0 : i32
    %c0_i32_0 = arith.constant 0 : i32
    %c0_i32_1 = arith.constant 0 : i32
    return %c0_i32, %c0_i32_0 : i32, i32
  }
  func.func @transform_2(%arg0: i32) -> (i32, i32) {
    %c0_i32 = arith.constant 0 : i32
    %c0_i32_0 = arith.constant 0 : i32
    %c0_i32_1 = arith.constant 0 : i32
    return %c0_i32, %c0_i32_0 : i32, i32
  }
  func.func @transform_3(%arg0: i32) -> (i32, i32) {
    %c0_i32 = arith.constant 0 : i32
    %c0_i32_0 = arith.constant 0 : i32
    return %arg0, %c0_i32 : i32, i32
  }
}

</mosaic_0001>

<bundles_post_ra>
// kernel: _lambda_.2
= control target key start
LH: loop header
LB: loop body
LE: loop exit
PB: predicated region body
PF: predicated region fallthrough
CT: control target
= control target key end

     0   :  { %s466_s12 = smov 0   ;;  %s519_s0 = inlined_call_operand.vmem [shape: bf16[128,64], index: 0, kind: input, shape index: {}]   ;;  %s520_s1 = inlined_call_operand.vmem [shape: bf16[64,64], index: 1, kind: input, shape index: {}]   ;;  %s521_s2 = inlined_call_operand.vmem [shape: f32[1,64], index: 2, kind: input, shape index: {}]   ;;  %s522_s3 = inlined_call_operand.vmem [shape: bf16[128,64], index: 3, kind: output, shape index: {}]  }
   0x1 LB: > { %s362_s13 = sadd.s32 4294967295, %s444_s12   ;;  %p366_p0 = scmp.ge.s32.totalorder %s444_s12, 1  ;;  %s444_s12 = sphi %s466_s12, %s13_s12  }
   0x2   : > { %p138_p1 = scmp.lt.s32.totalorder %s444_s12, 3 }
   0x4   : > { %p139_p2 = pnand %p366_p0, %p138_p1 }
   0x5   : > { %s367_s16 = sshll.u32 (!%p139_p2), %s362_s13, 3 }
   0x6   : > { %142 = sbr.rel (%p139_p2) target bundleno = 176 (0xb0), region = 32  ;;  %p163_p3 = scmp.lt.s32.totalorder (!%p139_p2), %s367_s16, 15 }
   0xb   : > { %v416_v0 = vld [vmem:[%s520_s1 + $0x18] sm:$0xff]  ;;  %v415_v1 = vld [vmem:[%s520_s1 + $0x10] sm:$0xff]  ;;  %s524_s16 = smov (!%p163_p3, %s367_s16), 15  ;;  %v414_v2 = vld [vmem:[%s520_s1 + $0x8] sm:$0xff]  ;;  %vm239_vm0 = vcmask 523264   ;;  %vm297_vm1 = vcmask 519168  }
   0xc   : > { %256 = vmatpush.bf16.msra.mxu0 %v416_v0  ;;  %417 = vmatpush.bf16.msra.mxu1 %v416_v0  ;;  %s368_s21 = sshll.u32 %s524_s16, 2  ;;  %v413_v3 = vld [vmem:[%s520_s1] sm:$0xff] }
   0xd   : > { %418 = vmatpush.bf16.msra.mxu2 %v416_v0  ;;  %419 = vmatpush.bf16.msra.mxu3 %v416_v0  ;;  %s166_s26 = scalar_lea.vmem %s519_s0, %s368_s21  ;;  %v437_v8 = vld [vmem:[%s521_s2] ss:$0 sm:$0xff]  ;;  %s498_s4 = scalar_lea.vmem %s522_s3, %s368_s21 }
   0xe   : > { %v409_v4 = vld [vmem:[%s166_s26] sm:$0xff]  ;;  %v410_v5 = vld [vmem:[%s166_s26 + $0x8] sm:$0xff]  ;;  %v411_v6 = vld [vmem:[%s166_s26 + $0x10] sm:$0xff] }
   0xf   : > { %v412_v7 = vld [vmem:[%s166_s26 + $0x18] sm:$0xff] }
  0x10   : > { %257 = vmatpush.bf16.msra.mxu0 %v415_v1  ;;  %420 = vmatpush.bf16.msra.mxu1 %v415_v1 }
  0x11   : > { %421 = vmatpush.bf16.msra.mxu2 %v415_v1  ;;  %422 = vmatpush.bf16.msra.mxu3 %v415_v1 }
  0x14   : > { %258 = vmatpush.bf16.msra.mxu0 %v414_v2  ;;  %423 = vmatpush.bf16.msra.mxu1 %v414_v2 }
  0x15   : > { %424 = vmatpush.bf16.msra.mxu2 %v414_v2  ;;  %425 = vmatpush.bf16.msra.mxu3 %v414_v2 }
  0x18   : > { %259 = vmatpush.bf16.msra.mxu0 %v413_v3  ;;  %426 = vmatpush.bf16.msra.mxu1 %v413_v3 }
  0x19   : > { %427 = vmatpush.bf16.msra.mxu2 %v413_v3  ;;  %428 = vmatpush.bf16.msra.mxu3 %v413_v3 }
  0x1b   : > { %403 = vmatmul.msk.bf16.vlgmr.msra.gmra.mxu0 %vm239_vm0, %v409_v4  ;;  %404 = vmatmul.msk.bf16.vlgmr.msra.gmra.mxu1 %vm239_vm0, %v410_v5 }
  0x1c   : > { %405 = vmatmul.msk.bf16.vlgmr.msra.gmra.mxu2 %vm239_vm0, %v411_v6  ;;  %406 = vmatmul.msk.bf16.vlgmr.msra.gmra.mxu3 %vm239_vm0, %v412_v7 }
  0x98   : > { %v261_v9 = vpop.f32.mrf.mxu0  ;;  %v266_v10 = vpop.f32.mrf.mxu1 }
  0x99   : > { %v262_v11 = vadd.f32 %v437_v8, %v261_v9  ;;  %v267_v12 = vadd.f32 %v437_v8, %v266_v10 }
  0x9b   : > { %v281_v13 = vmax.f32 %v262_v11, 0.0  ;;  %v283_v14 = vmax.f32 %v267_v12, 0.0 }
  0x9d   : > { %v289_v15 = vpack.c.bf16 %v281_v13, %v281_v13  ;;  %v291_v16 = vpack.c.bf16 %v283_v14, %v283_v14 }
  0x9f   : > { %298 = vst.msk [vmem:[%s498_s4] sm:$0xf] %vm297_vm1, %v289_v15  ;;  %v271_v17 = vpop.f32.mrf.mxu2  ;;  %v276_v18 = vpop.f32.mrf.mxu3 }
  0xa0   : > { %300 = vst.msk [vmem:[%s498_s4 + $0x8] sm:$0xf] %vm297_vm1, %v291_v16  ;;  %v272_v19 = vadd.f32 %v437_v8, %v271_v17  ;;  %v277_v20 = vadd.f32 %v437_v8, %v276_v18  ;;  %v263_v21 = vpop.f32.mrf.mxu0  ;;  %v268_v22 = vpop.f32.mrf.mxu1 }
  0xa1   : > { %v264_v23 = vadd.f32 %v437_v8, %v263_v21  ;;  %v269_v24 = vadd.f32 %v437_v8, %v268_v22 }
  0xa2   : > { %v285_v25 = vmax.f32 %v272_v19, 0.0  ;;  %v287_v26 = vmax.f32 %v277_v20, 0.0 }
  0xa3   : > { %v282_v27 = vmax.f32 %v264_v23, 0.0  ;;  %v284_v28 = vmax.f32 %v269_v24, 0.0 }
  0xa4   : > { %v293_v29 = vpack.c.bf16 %v285_v25, %v285_v25  ;;  %v295_v30 = vpack.c.bf16 %v287_v26, %v287_v26 }
  0xa5   : > { %v290_v31 = vpack.c.bf16 %v282_v27, %v282_v27  ;;  %v292_v32 = vpack.c.bf16 %v284_v28, %v284_v28 }
  0xa6   : > { %302 = vst.msk [vmem:[%s498_s4 + $0x10] sm:$0xf] %vm297_vm1, %v293_v29 }
  0xa7   : > { %304 = vst.msk [vmem:[%s498_s4 + $0x18] sm:$0xf] %vm297_vm1, %v295_v30  ;;  %v273_v33 = vpop.f32.mrf.mxu2  ;;  %v278_v34 = vpop.f32.mrf.mxu3 }
  0xa8   : > { %299 = vst.msk [vmem:[%s498_s4 + $0x4] sm:$0xf] %vm297_vm1, %v290_v31  ;;  %v274_v35 = vadd.f32 %v437_v8, %v273_v33  ;;  %v279_v36 = vadd.f32 %v437_v8, %v278_v34 }
  0xa9   : > { %301 = vst.msk [vmem:[%s498_s4 + $0xc] sm:$0xf] %vm297_vm1, %v292_v32 }
  0xaa   : > { %v286_v37 = vmax.f32 %v274_v35, 0.0  ;;  %v288_v38 = vmax.f32 %v279_v36, 0.0 }
  0xac   : > { %v294_v39 = vpack.c.bf16 %v286_v37, %v286_v37  ;;  %v296_v40 = vpack.c.bf16 %v288_v38, %v288_v38 }
  0xae   : > { %303 = vst.msk [vmem:[%s498_s4 + $0x14] sm:$0xf] %vm297_vm1, %v294_v39 }
  0xaf   : > { %305 = vst.msk [vmem:[%s498_s4 + $0x1c] sm:$0xf] %vm297_vm1, %v296_v40 }
  0xb0 PF: > { %s13_s12 = sadd.s32 1, %s444_s12  }
  0xb1   : > { %p10_p4 = scmp.ge.s32.totalorder %s13_s12, 4  }
  0xb3   :  { %12 = sbr.rel (!%p10_p4) target bundleno = 1 (0x1), region = 62 }

// kernel: _lambda_.3
= control target key start
LH: loop header
LB: loop body
LE: loop exit
PB: predicated region body
PF: predicated region fallthrough
CT: control target
= control target key end

     0   :  { %8 = vsyncpa [#allocation3], 0  ;;  %s1733_s0 = inlined_call_operand.vmem [shape: bf16[32,1024], index: 0, kind: input, shape index: {}]   ;;  %s1734_s1 = inlined_call_operand.vmem [shape: bf16[1024,128], index: 1, kind: input, shape index: {}]   ;;  %s1735_s2 = inlined_call_operand.vmem [shape: f32[1,128], index: 2, kind: input, shape index: {}]   ;;  %s1736_s3 = inlined_call_operand.hbm [shape: f32[32,128], index: 3, kind: output, shape index: {}]  }
   0x1   :  { %10 = vsyncpa [#allocation3 + $0x1], 0  ;;  %s1436_s12 = smov 0   ;;  %s1438_s13 = smov 0  }
   0x2   :  { %s1440_s14 = smov 0   ;;  %s1442_s15 = smov 0  }
   0x3 LB: > { %s1457_s16 = sadd.s32 4294967295, %s1412_s15   ;;  %s933_s17 = sadd.s32 4294967294, %s1412_s15   ;;  %s1412_s15 = sphi %s1442_s15, %s1742_s15   ;;  %s1408_s14 = sphi %s1440_s14, %s1741_s14   ;;  %s1404_s13 = sphi %s1438_s13, %s1740_s13   ;;  %s1400_s12 = sphi %s1436_s12, %s1739_s12  }
   0x4   : > { %s1461_s18 = sadd.s32 1, %s1412_s15   ;;  %s91_s19 = sadd.s32 1, %s1408_s14 }
   0x5   : > { %s88_s20 = ssub.s32 %s1412_s15, %s1461_s18  ;;  %p101_p0 = scmp.ne.s32.totalorder %s1408_s14, %s1404_s13 }
   0x6   : > { %p89_p1 = scmp.eq.s32.totalorder %s88_s20, 0  ;;  %p102_p2 = scmp.eq.s32.totalorder %s1457_s16, 1 }
   0x7   : > { %p107_p3 = scmp.ne.s32.totalorder %s1404_s13, %s1400_s12  ;;  %p108_p4 = scmp.eq.s32.totalorder %s933_s17, 1 }
   0x8   : > { %s1472_s21 = scalar_select %p89_p1, %s1408_s14, %s91_s19  }
   0x9   : > { %p1474_p5 = por %p102_p2, %p101_p0  ;;  %p1478_p6 = por %p108_p4, %p107_p3 }
   0xa   : > { %p936_p7 = scmp.ge.s32.totalorder %s1412_s15, 1  ;;  %p142_p8 = scmp.lt.s32.totalorder %s1412_s15, 3 }
   0xc   : > { %p143_p9 = pnand %p936_p7, %p142_p8 }
   0xd   : > { %s938_s30 = sshll.u32 (!%p143_p9), %s1457_s16, 1  ;;  %s1307_s17 = sshll.u32 (!%p143_p9), %s1457_s16, 4 }
   0xe   : > { %146 = sbr.rel (%p143_p9) target bundleno = 235 (0xeb), region = 32  ;;  %p168_p10 = scmp.lt.s32.totalorder (!%p143_p9), %s938_s30, 3 }
   0xf   : > { %s867_s24 = scalar_lea.hbm (!%p143_p9), %s1736_s3, %s1307_s17  ;;  %s1370_s6 = scalar_lea.hbm (!%p143_p9), %s1736_s3, 32 }
  0x10   : > { %s870_s27 = sshll.u32 (!%p143_p9), %s867_s24, 4  ;;  %s871_s27 = int_to_ptr.hbm [resolvable:$true] %s870_s27 }
  0x11   : > { %s1364_s28 = sshra.s32 (!%p143_p9), %s871_s27, 4  ;;  %s1365_s28 = int_to_ptr.hbm [resolvable:$true] %s1364_s28 }
  0x12   : > { %p1371_p0 = scmp.lt.s32.totalorder (!%p143_p9), %s1365_s28, %s1736_s3 }
  0x13   : > { %v1250_v0 = vld [vmem:[%s1734_s1 + $0x38] sm:$0xff]  ;;  %v1249_v4 = vld [vmem:[%s1734_s1 + $0x30] sm:$0xff]  ;;  %v1248_v8 = vld [vmem:[%s1734_s1 + $0x28] sm:$0xff]  ;;  %s1744_s30 = smov (!%p168_p10, %s938_s30), 3 }
  0x14   : > { %v1258_v1 = vld [vmem:[%s1734_s1 + $0x78] sm:$0xff]  ;;  %739 = vmatpush.bf16.msra.mxu0 %v1250_v0  ;;  %v1257_v5 = vld [vmem:[%s1734_s1 + $0x70] sm:$0xff]  ;;  %v1256_v9 = vld [vmem:[%s1734_s1 + $0x68] sm:$0xff]  ;;  %s1234_s11 = sshll.u32 %s1744_s30, 5  ;;  %s1366_s30 = scalar_lea.hbm %s1365_s28, 16 }
  0x15   : > { %v1266_v2 = vld [vmem:[%s1734_s1 + $0xb8] sm:$0xff]  ;;  %753 = vmatpush.bf16.msra.mxu1 %v1258_v1  ;;  %v1265_v6 = vld [vmem:[%s1734_s1 + $0xb0] sm:$0xff]  ;;  %v1264_v10 = vld [vmem:[%s1734_s1 + $0xa8] sm:$0xff]  ;;  %s1572_s4 = scalar_lea.vmem %s1733_s0, %s1234_s11  ;;  %p1367_p11 = scmp.ne.s32.totalorder %s1365_s28, %s1366_s30 }
  0x16   : > { %v1274_v3 = vld [vmem:[%s1734_s1 + $0xf8] sm:$0xff]  ;;  %767 = vmatpush.bf16.msra.mxu2 %v1266_v2  ;;  %v1273_v7 = vld [vmem:[%s1734_s1 + $0xf0] sm:$0xff]  ;;  %v1272_v11 = vld [vmem:[%s1734_s1 + $0xe8] sm:$0xff]  ;;  %p1372_p1 = scmp.lt.s32.totalorder %s1370_s6, %s1366_s30 }
  0x17   : > { %781 = vmatpush.bf16.msra.mxu3 %v1274_v3  ;;  %v1247_v12 = vld [vmem:[%s1734_s1 + $0x20] sm:$0xff]  ;;  %v1246_v16 = vld [vmem:[%s1734_s1 + $0x18] sm:$0xff]  ;;  %v1245_v20 = vld [vmem:[%s1734_s1 + $0x10] sm:$0xff]  ;;  %p1368_p12 = pnand %p1367_p11, %p1474_p5 }
  0x18   : > { %740 = vmatpush.bf16.msra.mxu0 %v1249_v4  ;;  %v1255_v13 = vld [vmem:[%s1734_s1 + $0x60] sm:$0xff]  ;;  %v1254_v17 = vld [vmem:[%s1734_s1 + $0x58] sm:$0xff]  ;;  %v1253_v21 = vld [vmem:[%s1734_s1 + $0x50] sm:$0xff]  ;;  %p1373_p2 = por %p1372_p1, %p1371_p0 }
  0x19   : > { %754 = vmatpush.bf16.msra.mxu1 %v1257_v5  ;;  %v1263_v14 = vld [vmem:[%s1734_s1 + $0xa0] sm:$0xff]  ;;  %v1262_v18 = vld [vmem:[%s1734_s1 + $0x98] sm:$0xff]  ;;  %v1261_v22 = vld [vmem:[%s1734_s1 + $0x90] sm:$0xff]  ;;  %p1369_p13 = pneg %p1368_p12 }
  0x1a   : > { %768 = vmatpush.bf16.msra.mxu2 %v1265_v6  ;;  %v1271_v15 = vld [vmem:[%s1734_s1 + $0xe0] sm:$0xff]  ;;  %v1270_v19 = vld [vmem:[%s1734_s1 + $0xd8] sm:$0xff]  ;;  %v1269_v23 = vld [vmem:[%s1734_s1 + $0xd0] sm:$0xff] }
  0x1b   : > { %782 = vmatpush.bf16.msra.mxu3 %v1273_v7  ;;  %v1244_v24 = vld [vmem:[%s1734_s1 + $0x8] sm:$0xff]  ;;  %v1243_v28 = vld [vmem:[%s1734_s1] sm:$0xff]  ;;  %v1282_v32 = vld [vmem:[%s1734_s1 + $0x138] sm:$0xff]  ;;  %p1374_p3 = pnand %p1373_p2, %p1369_p13 }
  0x1c   : > { %741 = vmatpush.bf16.msra.mxu0 %v1248_v8  ;;  %v1252_v25 = vld [vmem:[%s1734_s1 + $0x48] sm:$0xff]  ;;  %v1251_v29 = vld [vmem:[%s1734_s1 + $0x40] sm:$0xff]  ;;  %v1290_v33 = vld [vmem:[%s1734_s1 + $0x178] sm:$0xff] }
  0x1d   : > { %755 = vmatpush.bf16.msra.mxu1 %v1256_v9  ;;  %v1260_v26 = vld [vmem:[%s1734_s1 + $0x88] sm:$0xff]  ;;  %v1259_v30 = vld [vmem:[%s1734_s1 + $0x80] sm:$0xff]  ;;  %v1298_v42 = vld [vmem:[%s1734_s1 + $0x1b8] sm:$0xff] }
  0x1e   : > { %769 = vmatpush.bf16.msra.mxu2 %v1264_v10  ;;  %v1268_v27 = vld [vmem:[%s1734_s1 + $0xc8] sm:$0xff]  ;;  %v1267_v31 = vld [vmem:[%s1734_s1 + $0xc0] sm:$0xff]  ;;  %v1306_v43 = vld [vmem:[%s1734_s1 + $0x1f8] sm:$0xff] }
  0x1f   : > { %783 = vmatpush.bf16.msra.mxu3 %v1272_v11  ;;  %v951_v34 = vld [vmem:[%s1572_s4 + $0x8] sm:$0xf]  ;;  %v943_v36 = vld [vmem:[%s1572_s4] sm:$0xf]  ;;  %v1236_v38 = vld [vmem:[%s1572_s4 + $0xc] sm:$0xf] }
  0x20   : > { %742 = vmatpush.bf16.msra.mxu0 %v1247_v12  ;;  %v1240_v35 = vld [vmem:[%s1572_s4 + $0x24] sm:$0xf0]  ;;  %v1239_v37 = vld [vmem:[%s1572_s4 + $0x1c] sm:$0xf0]  ;;  %v953_v39 = vld [vmem:[%s1572_s4 + $0x28] sm:$0xf0] }
  0x21   : > { %756 = vmatpush.bf16.msra.mxu1 %v1255_v13  ;;  %v1235_v40 = vld [vmem:[%s1572_s4 + $0x4] sm:$0xf]  ;;  %v952_v44 = vor.u32 %v1240_v35, %v951_v34  ;;  %v944_v45 = vor.u32 %v1239_v37, %v943_v36  ;;  %v956_v46 = vor.u32 %v1236_v38, %v953_v39  ;;  %v1281_v48 = vld [vmem:[%s1734_s1 + $0x130] sm:$0xff]  ;;  %v1280_v52 = vld [vmem:[%s1734_s1 + $0x128] sm:$0xff] }
  0x22   : > { %770 = vmatpush.bf16.msra.mxu2 %v1263_v14  ;;  %v945_v41 = vld [vmem:[%s1572_s4 + $0x20] sm:$0xf0]  ;;  %v1289_v49 = vld [vmem:[%s1734_s1 + $0x170] sm:$0xff]  ;;  %v1288_v53 = vld [vmem:[%s1734_s1 + $0x168] sm:$0xff] }
  0x23   : > { %784 = vmatpush.bf16.msra.mxu3 %v1271_v15  ;;  %v948_v47 = vor.u32 %v1235_v40, %v945_v41  ;;  %v1297_v50 = vld [vmem:[%s1734_s1 + $0x1b0] sm:$0xff]  ;;  %v1296_v54 = vld [vmem:[%s1734_s1 + $0x1a8] sm:$0xff]  ;;  %v1279_v56 = vld [vmem:[%s1734_s1 + $0x120] sm:$0xff] }
  0x24   : > { %743 = vmatpush.bf16.msra.mxu0 %v1246_v16  ;;  %v1305_v51 = vld [vmem:[%s1734_s1 + $0x1f0] sm:$0xff]  ;;  %v1304_v55 = vld [vmem:[%s1734_s1 + $0x1e8] sm:$0xff]  ;;  %v1287_v57 = vld [vmem:[%s1734_s1 + $0x160] sm:$0xff] }
  0x25   : > { %757 = vmatpush.bf16.msra.mxu1 %v1254_v17  ;;  %v1295_v58 = vld [vmem:[%s1734_s1 + $0x1a0] sm:$0xff]  ;;  %v1278_v60 = vld [vmem:[%s1734_s1 + $0x118] sm:$0xff]  ;;  %v1277_v0 = vld [vmem:[%s1734_s1 + $0x110] sm:$0xff] }
  0x26   : > { %771 = vmatpush.bf16.msra.mxu2 %v1262_v18  ;;  %v1303_v59 = vld [vmem:[%s1734_s1 + $0x1e0] sm:$0xff]  ;;  %v1286_v61 = vld [vmem:[%s1734_s1 + $0x158] sm:$0xff]  ;;  %v1285_v1 = vld [vmem:[%s1734_s1 + $0x150] sm:$0xff] }
  0x27   : > { %785 = vmatpush.bf16.msra.mxu3 %v1270_v19  ;;  %v1294_v62 = vld [vmem:[%s1734_s1 + $0x198] sm:$0xff]  ;;  %v1293_v2 = vld [vmem:[%s1734_s1 + $0x190] sm:$0xff]  ;;  %v1276_v4 = vld [vmem:[%s1734_s1 + $0x108] sm:$0xff] }
  0x28   : > { %744 = vmatpush.bf16.msra.mxu0 %v1245_v20  ;;  %v1302_v63 = vld [vmem:[%s1734_s1 + $0x1d8] sm:$0xff]  ;;  %v1301_v3 = vld [vmem:[%s1734_s1 + $0x1d0] sm:$0xff]  ;;  %v1284_v5 = vld [vmem:[%s1734_s1 + $0x148] sm:$0xff] }
  0x29   : > { %758 = vmatpush.bf16.msra.mxu1 %v1253_v21  ;;  %v1292_v6 = vld [vmem:[%s1734_s1 + $0x188] sm:$0xff]  ;;  %v1275_v8 = vld [vmem:[%s1734_s1 + $0x100] sm:$0xff]  ;;  %v959_v12 = vld [vmem:[%s1572_s4 + $0x10] sm:$0xf] }
  0x2a   : > { %772 = vmatpush.bf16.msra.mxu2 %v1261_v22  ;;  %v1300_v7 = vld [vmem:[%s1734_s1 + $0x1c8] sm:$0xff]  ;;  %v1283_v9 = vld [vmem:[%s1734_s1 + $0x140] sm:$0xff]  ;;  %v1241_v13 = vld [vmem:[%s1572_s4 + $0x2c] sm:$0xf0] }
  0x2b   : > { %786 = vmatpush.bf16.msra.mxu3 %v1269_v23  ;;  %v1291_v10 = vld [vmem:[%s1734_s1 + $0x180] sm:$0xff]  ;;  %v1237_v14 = vld [vmem:[%s1572_s4 + $0x14] sm:$0xf]  ;;  %v967_v16 = vld [vmem:[%s1572_s4 + $0x18] sm:$0xf]  ;;  %v960_v20 = vor.u32 %v1241_v13, %v959_v12 }
  0x2c   : > { %745 = vmatpush.bf16.msra.mxu0 %v1244_v24  ;;  %v1299_v11 = vld [vmem:[%s1734_s1 + $0x1c0] sm:$0xff]  ;;  %v961_v15 = vld [vmem:[%s1572_s4 + $0x30] sm:$0xf0]  ;;  %v1242_v17 = vld [vmem:[%s1572_s4 + $0x34] sm:$0xf0] }
  0x2d   : > { %759 = vmatpush.bf16.msra.mxu1 %v1252_v25  ;;  %v1238_v18 = vld [vmem:[%s1572_s4 + $0x1c] sm:$0xf]  ;;  %v964_v21 = vor.u32 %v1237_v14, %v961_v15  ;;  %v968_v22 = vor.u32 %v1242_v17, %v967_v16  ;;  %v1349_v25 = vld [vmem:[%s1735_s2] ss:$0 sm:$0xff] }
  0x2e   : > { %773 = vmatpush.bf16.msra.mxu2 %v1260_v26  ;;  %v969_v19 = vld [vmem:[%s1572_s4 + $0x38] sm:$0xf0]  ;;  %s164_s4 = sand.u32 1, %s1404_s13  }
  0x2f   : > { %787 = vmatpush.bf16.msra.mxu3 %v1268_v27  ;;  %v972_v23 = vor.u32 %v1238_v18, %v969_v19  ;;  %s937_s11 = sshll.u32 %s164_s4, 4  ;;  %s856_s16 = scalar_lea.sflag [#allocation3], %s164_s4 }
  0x30   : > { %746 = vmatpush.bf16.msra.mxu0 %v1243_v28  ;;  %s166_s25 = scalar_lea.vmem [#allocation2], %s937_s11 }
  0x31   : > { %760 = vmatpush.bf16.msra.mxu1 %v1251_v29  ;;  %s868_s26 = sshll.u32 %s166_s25, 4  ;;  %s869_s26 = int_to_ptr.vmem [resolvable:$true] %s868_s26 }
  0x32   : > { %774 = vmatpush.bf16.msra.mxu2 %v1259_v30 }
  0x33   : > { %788 = vmatpush.bf16.msra.mxu3 %v1267_v31  ;;  %747 = vmatmul.bf16.vlgmr.msra.gmra.mxu0 %v944_v45 }
  0x34   : > { %795 = vmatpush.bf16.msrb.mxu0 %v1282_v32  ;;  %761 = vmatmul.bf16.vlgmr.msra.gmra.mxu1 %v948_v47 }
  0x35   : > { %809 = vmatpush.bf16.msrb.mxu1 %v1290_v33  ;;  %775 = vmatmul.bf16.vlgmr.msra.gmra.mxu2 %v952_v44 }
  0x36   : > { %823 = vmatpush.bf16.msrb.mxu2 %v1298_v42  ;;  %789 = vmatmul.bf16.vlgmr.msra.gmra.mxu3 %v956_v46 }
  0x37   : > { %837 = vmatpush.bf16.msrb.mxu3 %v1306_v43 }
  0x38   : > { %796 = vmatpush.bf16.msrb.mxu0 %v1281_v48 }
  0x39   : > { %810 = vmatpush.bf16.msrb.mxu1 %v1289_v49 }
  0x3a   : > { %824 = vmatpush.bf16.msrb.mxu2 %v1297_v50 }
  0x3b   : > { %838 = vmatpush.bf16.msrb.mxu3 %v1305_v51 }
  0x3c   : > { %797 = vmatpush.bf16.msrb.mxu0 %v1280_v52 }
  0x3d   : > { %811 = vmatpush.bf16.msrb.mxu1 %v1288_v53 }
  0x3e   : > { %825 = vmatpush.bf16.msrb.mxu2 %v1296_v54 }
  0x3f   : > { %839 = vmatpush.bf16.msrb.mxu3 %v1304_v55 }
  0x40   : > { %798 = vmatpush.bf16.msrb.mxu0 %v1279_v56 }
  0x41   : > { %812 = vmatpush.bf16.msrb.mxu1 %v1287_v57 }
  0x42   : > { %826 = vmatpush.bf16.msrb.mxu2 %v1295_v58 }
  0x43   : > { %840 = vmatpush.bf16.msrb.mxu3 %v1303_v59 }
  0x44   : > { %799 = vmatpush.bf16.msrb.mxu0 %v1278_v60 }
  0x45   : > { %813 = vmatpush.bf16.msrb.mxu1 %v1286_v61 }
  0x46   : > { %827 = vmatpush.bf16.msrb.mxu2 %v1294_v62 }
  0x47   : > { %841 = vmatpush.bf16.msrb.mxu3 %v1302_v63 }
  0x48   : > { %800 = vmatpush.bf16.msrb.mxu0 %v1277_v0 }
  0x49   : > { %814 = vmatpush.bf16.msrb.mxu1 %v1285_v1 }
  0x4a   : > { %828 = vmatpush.bf16.msrb.mxu2 %v1293_v2 }
  0x4b   : > { %842 = vmatpush.bf16.msrb.mxu3 %v1301_v3 }
  0x4c   : > { %801 = vmatpush.bf16.msrb.mxu0 %v1276_v4 }
  0x4d   : > { %815 = vmatpush.bf16.msrb.mxu1 %v1284_v5 }
  0x4e   : > { %829 = vmatpush.bf16.msrb.mxu2 %v1292_v6 }
  0x4f   : > { %843 = vmatpush.bf16.msrb.mxu3 %v1300_v7 }
  0x50   : > { %802 = vmatpush.bf16.msrb.mxu0 %v1275_v8 }
  0x51   : > { %816 = vmatpush.bf16.msrb.mxu1 %v1283_v9 }
  0x52   : > { %830 = vmatpush.bf16.msrb.mxu2 %v1291_v10 }
  0x53   : > { %844 = vmatpush.bf16.msrb.mxu3 %v1299_v11  ;;  %803 = vmatmul.bf16.vlgmr.msrb.gmra.mxu0 %v960_v20 }
  0x54   : > { %817 = vmatmul.bf16.vlgmr.msrb.gmra.mxu1 %v964_v21 }
  0x55   : > { %831 = vmatmul.bf16.vlgmr.msrb.gmra.mxu2 %v968_v22 }
  0x56   : > { %845 = vmatmul.bf16.vlgmr.msrb.gmra.mxu3 %v972_v23 }
  0xb0   : > { %v748_v24 = vpop.f32.mrf.mxu0 }
  0xb1   : > { %v762_v26 = vpop.f32.mrf.mxu1  ;;  %v749_v27 = vadd.f32 %v1349_v25, %v748_v24 }
  0xb3   : > { %v763_v30 = vadd.f32 %v762_v26, %v749_v27 }
  0xb8   : > { %v776_v28 = vpop.f32.mrf.mxu2  ;;  %v750_v31 = vpop.f32.mrf.mxu0 }
  0xb9   : > { %v790_v29 = vpop.f32.mrf.mxu3  ;;  %v764_v32 = vpop.f32.mrf.mxu1  ;;  %v777_v33 = vadd.f32 %v776_v28, %v763_v30  ;;  %v751_v34 = vadd.f32 %v1349_v25, %v750_v31 }
  0xbb   : > { %v791_v37 = vadd.f32 %v790_v29, %v777_v33  ;;  %v765_v38 = vadd.f32 %v764_v32, %v751_v34 }
  0xc0   : > { %v778_v35 = vpop.f32.mrf.mxu2 }
  0xc1   : > { %v792_v36 = vpop.f32.mrf.mxu3  ;;  %v779_v42 = vadd.f32 %v778_v35, %v765_v38 }
  0xc3   : > { %v793_v46 = vadd.f32 %v792_v36, %v779_v42 }
  0xd0   : > { %v804_v39 = vpop.f32.mrf.mxu0 }
  0xd1   : > { %v805_v40 = vadd.f32 %v804_v39, %v791_v37  ;;  %v818_v41 = vpop.f32.mrf.mxu1 }
  0xd3   : > { %v819_v43 = vadd.f32 %v818_v41, %v805_v40 }
  0xd8   : > { %v832_v44 = vpop.f32.mrf.mxu2  ;;  %v806_v48 = vpop.f32.mrf.mxu0 }
  0xd9   : > { %v846_v45 = vpop.f32.mrf.mxu3  ;;  %v833_v47 = vadd.f32 %v832_v44, %v819_v43  ;;  %v807_v50 = vadd.f32 %v806_v48, %v793_v46  ;;  %v820_v52 = vpop.f32.mrf.mxu1 }
  0xdb   : > { %v847_v49 = vadd.f32 %v846_v45, %v833_v47  ;;  %v821_v53 = vadd.f32 %v820_v52, %v807_v50 }
  0xdd   : > { %v851_v51 = vmax.f32 %v847_v49, 0.0 }
  0xdf   : > { %853 = vst [vmem:[%s166_s25] sm:$0xff] %v851_v51 }
  0xe0   : > { %v834_v54 = vpop.f32.mrf.mxu2 }
  0xe1   : > { %v835_v55 = vadd.f32 %v834_v54, %v821_v53  ;;  %v848_v56 = vpop.f32.mrf.mxu3 }
  0xe3   : > { %v849_v57 = vadd.f32 %v848_v56, %v835_v55 }
  0xe5   : > { %v852_v58 = vmax.f32 %v849_v57, 0.0 }
  0xe7   : > { %854 = vst [vmem:[%s166_s25 + $0x8] sm:$0xff] %v852_v58 }
  0xe8   : > { %1377 = shalt.err (!%p1374_p3)
}
  0xe9   : > { %s1414_s9 = smov 128   ;;  %s1415_s10 = smov 8  }
  0xea   : > { %1308 = dma.vmem_to_hbm [thread:$0]  (%p1474_p5), %s869_s26, 256, %s871_s27, %s856_s16, %s1414_s9, %s1414_s9, %s1415_s10  }
  0xeb PF: > { %p1314_p4 = scmp.ge.s32.totalorder %s1412_s15, 2  ;;  %s885_s4 = sand.u32 1, %s1400_s12  }
  0xec   : > { %s886_s11 = scalar_lea.sflag [#allocation3], %s885_s4 }
  0xed   : > { %p1311_p7 = pnand %p1314_p4, %p1478_p6 }
  0xef   : > { %p1312_p8 = pneg %p1311_p7 }
  0xf1   : > { %1395 = dma.done.wait (%p1312_p8), %s886_s11, 256  }
  0xf2   : > { %1397 = vsyncadd (%p1312_p8), %s886_s11, 4294967040  ;;  %p13_p9 = scmp.ge.s32.totalorder %s1461_s18, 4   ;;  %s1739_s12 = smov %s1404_s13 }
  0xf3   : > { %s1740_s13 = smov %s1408_s14  ;;  %s1741_s14 = smov %s1472_s21 }
  0xf4   : > { %s1742_s15 = smov %s1461_s18  ;;  %15 = sbr.rel (!%p13_p9) target bundleno = 3 (0x3), region = 67 }
  0xf9   :  { %892 = vsyncpa [#allocation3], 1 }
  0xfa   :  { %894 = vsyncpa [#allocation3 + $0x1], 1 }

</bundles_post_ra>
